<compile_context>
chip_gen: v6e
topology: v6e:2x2x1
jax: 0.10.0
libtpu: 0.0.40
codegen_flags: <defaults>
</compile_context>

<pallas_src>
import functools

import numpy as np
import jax
import jax.numpy as jnp
from jax.experimental import pallas as pl
from jax.experimental.pallas import tpu as pltpu

L = 7                      # positional mapping order used by the policy
SCALE = 1.0                # PositionalMapping scale (default)
NEG_SLOPE = 0.2            # LeakyReLU negative slope
PI = 3.1415927410125732    # exact constant used by the PyTorch module
HIDDEN_SIZE = 128          # H
HIDDEN_LAYERS = 2
FUSED_WIDTH = 2 * HIDDEN_SIZE   # 256: actor + critic stacked along lanes
MAPPED_PAD = 128                # lane-dense (padded) positional-mapping width


def _leaky_relu(v):
    return jnp.where(v >= 0, v, NEG_SLOPE * v)


# ----------------------------- Pallas kernel ------------------------------ #
def _actor_critic_kernel(x_ref, const_ref, w_ref, out_ref, *,
                         num_actions, input_dim, r_rows, fuse_hidden):
    H, HW, MP = HIDDEN_SIZE, FUSED_WIDTH, MAPPED_PAD
    f32 = jnp.float32

    # ---- lane-dense positional mapping: one (B,128) sin pass --------------
    # x_b[:, j] = x[:, j % input_dim] via a tiny constant replication matmul.
    x = x_ref[...].astype(f32)
    rep = const_ref[0:input_dim, 0:MP]                        # (input_dim, 128)
    x_b = jnp.dot(x, rep, preferred_element_type=f32)         # (B, 128)

    c = const_ref[r_rows:r_rows + 8, :]                       # (8, 256) consts
    amp_id = c[0:1, 0:MP]
    amp_sin = c[1:2, 0:MP]
    freq = c[2:3, 0:MP]
    phase = c[3:4, 0:MP]
    b1, b2, b3 = c[4:5, :], c[5:6, :], c[6:7, :]              # (1, 256) each
    b4 = c[7:8, 0:MP]                                         # (1, 128)

    # identity / sin / cos (as shifted sin) / zero-pad lanes, all in one pass
    mapped = amp_id * x_b + amp_sin * jnp.sin(freq * x_b + phase)   # (B, 128)

    # ---- layer 1: actor & critic stacked along the output lanes -----------
    w1 = w_ref[0:MP, :]                                       # (128, 256)
    h = _leaky_relu(jnp.dot(mapped, w1, preferred_element_type=f32) + b1)

    if fuse_hidden:
        # v6e/v7x: 256-wide MXU -> block-diagonal fused hidden layers.
        w2 = w_ref[HW:2 * HW, :]
        w3 = w_ref[2 * HW:3 * HW, :]
        w4 = w_ref[3 * HW:4 * HW, 0:MP]
        h = _leaky_relu(jnp.dot(h, w2, preferred_element_type=f32) + b2)
        h = _leaky_relu(jnp.dot(h, w3, preferred_element_type=f32) + b3)
        y = jnp.dot(h, w4, preferred_element_type=f32) + b4   # (B, 128)
    else:
        # v5e (128-wide MXU): keep the hidden matmuls 128x128.
        ha, hc = h[:, 0:H], h[:, H:HW]
        w2a = w_ref[HW:HW + H, 0:H]
        w2c = w_ref[HW + H:2 * HW, H:HW]
        w3a = w_ref[2 * HW:2 * HW + H, 0:H]
        w3c = w_ref[2 * HW + H:3 * HW, H:HW]
        w4a = w_ref[3 * HW:3 * HW + H, 0:MP]
        w4c = w_ref[3 * HW + H:4 * HW, 0:MP]
        ha = _leaky_relu(jnp.dot(ha, w2a, preferred_element_type=f32) + b2[:, 0:H])
        hc = _leaky_relu(jnp.dot(hc, w2c, preferred_element_type=f32) + b2[:, H:HW])
        ha = _leaky_relu(jnp.dot(ha, w3a, preferred_element_type=f32) + b3[:, 0:H])
        hc = _leaky_relu(jnp.dot(hc, w3c, preferred_element_type=f32) + b3[:, H:HW])
        y = (jnp.dot(ha, w4a, preferred_element_type=f32)
             + jnp.dot(hc, w4c, preferred_element_type=f32) + b4)   # (B, 128)

    # ---- softmax over the actor lanes; value lane passes through ----------
    lane = jax.lax.broadcasted_iota(jnp.int32, y.shape, 1)
    is_logit = lane < num_actions
    logits = jnp.where(is_logit, y, -jnp.inf)                 # mask padded lanes
    m = jnp.max(logits, axis=-1, keepdims=True)
    e = jnp.where(is_logit, jnp.exp(logits - m), 0.0)
    s = jnp.sum(e, axis=-1, keepdims=True)
    inv = pl.reciprocal(s, approx=True)                       # EUP slot
    inv = inv * (2.0 - s * inv)                               # one Newton step
    # lanes [0,NA): probs; lane NA: value; remaining lanes: zeros.
    out_ref[...] = jnp.where(is_logit, e * inv, y)


# ------------------------------ param packing ------------------------------ #
def pack_actor_critic_params(actor_params, critic_params, input_dim,
                             l=L, scale=SCALE):
    """Pack weights, biases and mapping constants into 2 VMEM-friendly slabs."""
    H, HW, MP = HIDDEN_SIZE, FUSED_WIDTH, MAPPED_PAD
    f32 = jnp.float32
    groups = 2 * l + 1
    mapped_dim = input_dim * groups
    assert mapped_dim <= MP, "padded positional mapping must fit in 128 lanes"
    num_actions = actor_params[-1][0].shape[1]
    assert num_actions + 1 <= MP

    (aw1, ab1), (aw2, ab2), (aw3, ab3), (aw4, ab4) = actor_params
    (cw1, cb1), (cw2, cb2), (cw3, cb3), (cw4, cb4) = critic_params

    # ---- weight slab (4*256, 256): one 256-row band per layer --------------
    w1_band = jnp.zeros((HW, HW), f32)
    w1_band = w1_band.at[:mapped_dim, :H].set(aw1).at[:mapped_dim, H:].set(cw1)

    def blockdiag(a, cmat):
        return jnp.zeros((HW, HW), f32).at[:H, :H].set(a).at[H:, H:].set(cmat)

    w2_band = blockdiag(aw2, cw2)
    w3_band = blockdiag(aw3, cw3)
    w4_band = jnp.zeros((HW, HW), f32)
    w4_band = (w4_band.at[:H, :num_actions].set(aw4)
                      .at[H:, num_actions:num_actions + 1].set(cw4))
    w_slab = jnp.concatenate([w1_band, w2_band, w3_band, w4_band], axis=0)

    # ---- constant slab: replication matrix + mapping rows + biases ---------
    r_rows = max(8, -(-input_dim // 8) * 8)
    jlane = np.arange(MP)
    valid = jlane < mapped_dim
    grp = jlane // input_dim          # 0: identity, 2k+1: sin(2^k), 2k+2: cos(2^k)
    src = jlane % input_dim
    rep = ((src[None, :] == np.arange(input_dim)[:, None]) & valid[None, :])
    k = np.maximum(grp - 1, 0) // 2
    amp_id = np.where(valid & (grp == 0), 1.0, 0.0)            # (x*s)/s == x
    amp_sin = np.where(valid & (grp > 0), 1.0 / scale, 0.0)
    freq = np.where(valid & (grp > 0), (2.0 ** k) * PI * scale, 0.0)
    phase = np.where(valid & (grp > 0) & (grp % 2 == 0), PI / 2.0, 0.0)

    const = jnp.zeros((r_rows + 8, HW), f32)
    const = const.at[:input_dim, :MP].set(jnp.asarray(rep, f32))
    const = const.at[r_rows + 0, :MP].set(jnp.asarray(amp_id, f32))
    const = const.at[r_rows + 1, :MP].set(jnp.asarray(amp_sin, f32))
    const = const.at[r_rows + 2, :MP].set(jnp.asarray(freq, f32))
    const = const.at[r_rows + 3, :MP].set(jnp.asarray(phase, f32))
    const = const.at[r_rows + 4, :H].set(ab1[0]).at[r_rows + 4, H:].set(cb1[0])
    const = const.at[r_rows + 5, :H].set(ab2[0]).at[r_rows + 5, H:].set(cb2[0])
    const = const.at[r_rows + 6, :H].set(ab3[0]).at[r_rows + 6, H:].set(cb3[0])
    const = (const.at[r_rows + 7, :num_actions].set(ab4[0])
                  .at[r_rows + 7, num_actions].set(cb4[0, 0]))

    meta = dict(num_actions=int(num_actions), input_dim=int(input_dim),
                r_rows=int(r_rows))
    return const, w_slab, meta


def _use_wide_mxu():
    """256-wide-MXU chips (v6e/v7x) -> fuse hidden layers block-diagonally."""
    try:
        kind = jax.devices()[0].device_kind.lower()
    except Exception:
        return True
    return not any(t in kind for t in ("v2", "v3", "v4", "v5"))


# -------------------------------- wrapper ---------------------------------- #
def actor_critic_forward(x, const_slab, w_slab, meta, *, fuse_hidden=None):
    """x: (B, input_dim) f32. Returns (probs (B, num_actions), value (B, 1))."""
    if fuse_hidden is None:
        fuse_hidden = _use_wide_mxu()
    B = x.shape[0]
    MP = MAPPED_PAD
    num_actions = meta["num_actions"]

    kernel = functools.partial(
        _actor_critic_kernel,
        num_actions=num_actions, input_dim=meta["input_dim"],
        r_rows=meta["r_rows"], fuse_hidden=bool(fuse_hidden))

    out_shape = jax.ShapeDtypeStruct((B, MP), jnp.float32)
    vmem = pltpu.MemorySpace.VMEM

    if B >= 256 and B % 128 == 0:
        # Real batch sizes: grid over the batch; weights/consts stay resident.
        bm = 128
        out = pl.pallas_call(
            kernel,
            out_shape=out_shape,
            grid=(B // bm,),
            in_specs=[
                pl.BlockSpec((bm, x.shape[1]), lambda i: (i, 0)),
                pl.BlockSpec(const_slab.shape, lambda i: (0, 0)),
                pl.BlockSpec(w_slab.shape, lambda i: (0, 0)),
            ],
            out_specs=pl.BlockSpec((bm, MP), lambda i: (i, 0)),
            compiler_params=pltpu.CompilerParams(
                dimension_semantics=("parallel",)),
        )(x, const_slab, w_slab)
    else:
        # Tiny batch: single step, everything resident in VMEM (3 input DMAs).
        out = pl.pallas_call(
            kernel,
            out_shape=out_shape,
            in_specs=[pl.BlockSpec(memory_space=vmem)] * 3,
            out_specs=pl.BlockSpec(memory_space=vmem),
        )(x, const_slab, w_slab)

    probs = out[:, :num_actions]
    value = out[:, num_actions:num_actions + 1]
    return probs, value


# --------------------------- params / reference ---------------------------- #
def init_mlp_params(key, input_dim, output_dim,
                    hidden_layers=HIDDEN_LAYERS, hidden_size=HIDDEN_SIZE, l=L):
    """PyTorch-Linear-style init: U(-1/sqrt(fan_in), 1/sqrt(fan_in))."""
    mapped_dim = input_dim * (2 * l + 1)
    dims = [mapped_dim] + [hidden_size] * (hidden_layers + 1) + [output_dim]
    params = []
    for i in range(len(dims) - 1):
        key, kw, kb = jax.random.split(key, 3)
        bound = 1.0 / np.sqrt(dims[i])
        w = jax.random.uniform(kw, (dims[i], dims[i + 1]), jnp.float32, -bound, bound)
        b = jax.random.uniform(kb, (1, dims[i + 1]), jnp.float32, -bound, bound)
        params.append((w, b))
    return params


def _positional_mapping_ref(x):
    x = x * SCALE
    feats = [x]
    for i in range(L):
        feats.append(jnp.sin((2.0 ** i) * PI * x))
        feats.append(jnp.cos((2.0 ** i) * PI * x))
    return jnp.concatenate(feats, axis=-1) / SCALE


def _mlp_ref(xm, params):
    h = xm
    for k, (w, b) in enumerate(params):
        h = h @ w + b
        if k < len(params) - 1:
            h = jnp.where(h >= 0, h, NEG_SLOPE * h)
    return h


def reference_forward(x, actor_params, critic_params):
    xm = _positional_mapping_ref(x)
    probs = jax.nn.softmax(_mlp_ref(xm, actor_params), axis=-1)
    value = _mlp_ref(xm, critic_params)
    return probs, value


# TODO(synk): get_action (host-side categorical sampling) and update_ac /
# RMSprop optimizer are host/training logic, not forward-pass kernels.

if __name__ == "__main__":
    B, INPUT_DIM, OUTPUT_DIM = 2, 8, 4

    key = jax.random.PRNGKey(0)
    kx, ka, kc = jax.random.split(key, 3)
    x = jax.random.normal(kx, (B, INPUT_DIM), jnp.float32)

    actor_params = init_mlp_params(ka, INPUT_DIM, OUTPUT_DIM)
    critic_params = init_mlp_params(kc, INPUT_DIM, 1)

    # Pack once (wrapper-side param prep: padding/fusion/constants).
    const_slab, w_slab, meta = pack_actor_critic_params(
        actor_params, critic_params, INPUT_DIM)

    probs, value = actor_critic_forward(x, const_slab, w_slab, meta)
    jax.block_until_ready((probs, value))

    ref_probs, ref_value = reference_forward(x, actor_params, critic_params)
    # 1e-3 tolerance: cos computed as phase-shifted sin + approx-reciprocal
    # softmax introduce small fp32 deviations at the highest frequencies.
    assert np.allclose(np.asarray(probs), np.asarray(ref_probs), rtol=1e-3, atol=1e-3)
    assert np.allclose(np.asarray(value), np.asarray(ref_value), rtol=1e-3, atol=1e-3)

    # Also exercise the 128-wide (v5e-style) hidden-layer path.
    probs2, value2 = actor_critic_forward(x, const_slab, w_slab, meta,
                                          fuse_hidden=False)
    jax.block_until_ready((probs2, value2))
    assert np.allclose(np.asarray(probs2), np.asarray(ref_probs), rtol=1e-3, atol=1e-3)
    assert np.allclose(np.asarray(value2), np.asarray(ref_value), rtol=1e-3, atol=1e-3)

    print("KERNEL_OK")
</pallas_src>

<mosaic_0001>
module attributes {stable_mosaic.version = 11 : i64} {
  func.func @_actor_critic_kernel(%arg0: memref<2x8xf32, #tpu.memory_space<vmem>>, %arg1: memref<16x256xf32, #tpu.memory_space<vmem>>, %arg2: memref<1024x256xf32, #tpu.memory_space<vmem>>, %arg3: memref<2x128xf32, #tpu.memory_space<vmem>>) attributes {dimension_semantics = [], scalar_prefetch = 0 : i64, scratch_operands = 0 : i64, tpu.core_type = #tpu.core_type<tc>} {
    %c0 = arith.constant 0 : index
    %c0_0 = arith.constant 0 : index
    %0 = vector.load %arg0[%c0, %c0_0] : memref<2x8xf32, #tpu.memory_space<vmem>>, vector<2x8xf32>
    %c0_1 = arith.constant 0 : index
    %c0_2 = arith.constant 0 : index
    %1 = vector.load %arg1[%c0_1, %c0_2] : memref<16x256xf32, #tpu.memory_space<vmem>>, vector<8x128xf32>
    %cst = arith.constant dense<0.000000e+00> : vector<2x128xf32>
    %2 = tpu.matmul %0, %1, %cst {dimension_numbers = #tpu.dot_dimension_numbers<[1], [0], [0], [1], [0, 0, 1, 1], [], []>} : vector<2x8xf32>, vector<8x128xf32>, vector<2x128xf32> -> vector<2x128xf32>
    %c8 = arith.constant 8 : index
    %c0_3 = arith.constant 0 : index
    %3 = vector.load %arg1[%c8, %c0_3] : memref<16x256xf32, #tpu.memory_space<vmem>>, vector<8x256xf32>
    %4 = vector.extract_strided_slice %3 {offsets = [0, 0], sizes = [1, 128], strides = [1, 1]} : vector<8x256xf32> to vector<1x128xf32>
    %5 = vector.extract_strided_slice %3 {offsets = [1, 0], sizes = [1, 128], strides = [1, 1]} : vector<8x256xf32> to vector<1x128xf32>
    %6 = vector.extract_strided_slice %3 {offsets = [2, 0], sizes = [1, 128], strides = [1, 1]} : vector<8x256xf32> to vector<1x128xf32>
    %7 = vector.extract_strided_slice %3 {offsets = [3, 0], sizes = [1, 128], strides = [1, 1]} : vector<8x256xf32> to vector<1x128xf32>
    %8 = vector.extract_strided_slice %3 {offsets = [4, 0], sizes = [1, 256], strides = [1, 1]} : vector<8x256xf32> to vector<1x256xf32>
    %9 = vector.extract_strided_slice %3 {offsets = [5, 0], sizes = [1, 256], strides = [1, 1]} : vector<8x256xf32> to vector<1x256xf32>
    %10 = vector.extract_strided_slice %3 {offsets = [6, 0], sizes = [1, 256], strides = [1, 1]} : vector<8x256xf32> to vector<1x256xf32>
    %11 = vector.extract_strided_slice %3 {offsets = [7, 0], sizes = [1, 128], strides = [1, 1]} : vector<8x256xf32> to vector<1x128xf32>
    %12 = vector.broadcast %4 : vector<1x128xf32> to vector<2x128xf32>
    %13 = arith.mulf %12, %2 : vector<2x128xf32>
    %14 = vector.broadcast %6 : vector<1x128xf32> to vector<2x128xf32>
    %15 = arith.mulf %14, %2 : vector<2x128xf32>
    %16 = vector.broadcast %7 : vector<1x128xf32> to vector<2x128xf32>
    %17 = arith.addf %15, %16 : vector<2x128xf32>
    %18 = math.sin %17 : vector<2x128xf32>
    %19 = vector.broadcast %5 : vector<1x128xf32> to vector<2x128xf32>
    %20 = arith.mulf %19, %18 : vector<2x128xf32>
    %21 = arith.addf %13, %20 : vector<2x128xf32>
    %c0_4 = arith.constant 0 : index
    %c0_5 = arith.constant 0 : index
    %22 = vector.load %arg2[%c0_4, %c0_5] : memref<1024x256xf32, #tpu.memory_space<vmem>>, vector<128x256xf32>
    %cst_6 = arith.constant dense<0.000000e+00> : vector<2x256xf32>
    %23 = tpu.matmul %21, %22, %cst_6 {dimension_numbers = #tpu.dot_dimension_numbers<[1], [0], [0], [1], [0, 0, 1, 1], [], []>} : vector<2x128xf32>, vector<128x256xf32>, vector<2x256xf32> -> vector<2x256xf32>
    %24 = vector.broadcast %8 : vector<1x256xf32> to vector<2x256xf32>
    %25 = arith.addf %23, %24 : vector<2x256xf32>
    %cst_7 = arith.constant 0.000000e+00 : f32
    %26 = vector.broadcast %cst_7 : f32 to vector<2x256xf32>
    %27 = arith.cmpf oge, %25, %26 : vector<2x256xf32>
    %cst_8 = arith.constant 2.000000e-01 : f32
    %28 = vector.broadcast %cst_8 : f32 to vector<2x256xf32>
    %29 = arith.mulf %28, %25 : vector<2x256xf32>
    %30 = arith.select %27, %25, %29 : vector<2x256xi1>, vector<2x256xf32>
    %c256 = arith.constant 256 : index
    %c0_9 = arith.constant 0 : index
    %31 = vector.load %arg2[%c256, %c0_9] : memref<1024x256xf32, #tpu.memory_space<vmem>>, vector<256x256xf32>
    %c512 = arith.constant 512 : index
    %c0_10 = arith.constant 0 : index
    %32 = vector.load %arg2[%c512, %c0_10] : memref<1024x256xf32, #tpu.memory_space<vmem>>, vector<256x256xf32>
    %c768 = arith.constant 768 : index
    %c0_11 = arith.constant 0 : index
    %33 = vector.load %arg2[%c768, %c0_11] : memref<1024x256xf32, #tpu.memory_space<vmem>>, vector<256x128xf32>
    %cst_12 = arith.constant dense<0.000000e+00> : vector<2x256xf32>
    %34 = tpu.matmul %30, %31, %cst_12 {dimension_numbers = #tpu.dot_dimension_numbers<[1], [0], [0], [1], [0, 0, 1, 1], [], []>} : vector<2x256xf32>, vector<256x256xf32>, vector<2x256xf32> -> vector<2x256xf32>
    %35 = vector.broadcast %9 : vector<1x256xf32> to vector<2x256xf32>
    %36 = arith.addf %34, %35 : vector<2x256xf32>
    %cst_13 = arith.constant 0.000000e+00 : f32
    %37 = vector.broadcast %cst_13 : f32 to vector<2x256xf32>
    %38 = arith.cmpf oge, %36, %37 : vector<2x256xf32>
    %cst_14 = arith.constant 2.000000e-01 : f32
    %39 = vector.broadcast %cst_14 : f32 to vector<2x256xf32>
    %40 = arith.mulf %39, %36 : vector<2x256xf32>
    %41 = arith.select %38, %36, %40 : vector<2x256xi1>, vector<2x256xf32>
    %cst_15 = arith.constant dense<0.000000e+00> : vector<2x256xf32>
    %42 = tpu.matmul %41, %32, %cst_15 {dimension_numbers = #tpu.dot_dimension_numbers<[1], [0], [0], [1], [0, 0, 1, 1], [], []>} : vector<2x256xf32>, vector<256x256xf32>, vector<2x256xf32> -> vector<2x256xf32>
    %43 = vector.broadcast %10 : vector<1x256xf32> to vector<2x256xf32>
    %44 = arith.addf %42, %43 : vector<2x256xf32>
    %cst_16 = arith.constant 0.000000e+00 : f32
    %45 = vector.broadcast %cst_16 : f32 to vector<2x256xf32>
    %46 = arith.cmpf oge, %44, %45 : vector<2x256xf32>
    %cst_17 = arith.constant 2.000000e-01 : f32
    %47 = vector.broadcast %cst_17 : f32 to vector<2x256xf32>
    %48 = arith.mulf %47, %44 : vector<2x256xf32>
    %49 = arith.select %46, %44, %48 : vector<2x256xi1>, vector<2x256xf32>
    %cst_18 = arith.constant dense<0.000000e+00> : vector<2x128xf32>
    %50 = tpu.matmul %49, %33, %cst_18 {dimension_numbers = #tpu.dot_dimension_numbers<[1], [0], [0], [1], [0, 0, 1, 1], [], []>} : vector<2x256xf32>, vector<256x128xf32>, vector<2x128xf32> -> vector<2x128xf32>
    %51 = vector.broadcast %11 : vector<1x128xf32> to vector<2x128xf32>
    %52 = arith.addf %50, %51 : vector<2x128xf32>
    %53 = tpu.iota {dimensions = array<i32: 1>} : vector<2x128xi32>
    %c4_i32 = arith.constant 4 : i32
    %54 = vector.broadcast %c4_i32 : i32 to vector<2x128xi32>
    %55 = arith.cmpi slt, %53, %54 : vector<2x128xi32>
    %cst_19 = arith.constant 0xFF800000 : f32
    %56 = vector.broadcast %cst_19 : f32 to vector<2x128xf32>
    %57 = arith.select %55, %52, %56 : vector<2x128xi1>, vector<2x128xf32>
    %cst_20 = arith.constant dense<0xFF800000> : vector<2xf32>
    %58 = vector.multi_reduction <maximumf>, %57, %cst_20 [1] : vector<2x128xf32> to vector<2xf32>
    %59 = vector.shape_cast %58 : vector<2xf32> to vector<2x1xf32>
    %60 = vector.broadcast %59 : vector<2x1xf32> to vector<2x128xf32>
    %61 = arith.subf %57, %60 : vector<2x128xf32>
    %62 = math.exp %61 : vector<2x128xf32>
    %cst_21 = arith.constant 0.000000e+00 : f32
    %63 = vector.broadcast %cst_21 : f32 to vector<2x128xf32>
    %64 = arith.select %55, %62, %63 : vector<2x128xi1>, vector<2x128xf32>
    %cst_22 = arith.constant dense<0.000000e+00> : vector<2xf32>
    %65 = vector.multi_reduction <add>, %64, %cst_22 [1] : vector<2x128xf32> to vector<2xf32>
    %66 = vector.shape_cast %65 : vector<2xf32> to vector<2x1xf32>
    %67 = tpu.reciprocal %66 {approx = true} : vector<2x1xf32> -> vector<2x1xf32>
    %68 = arith.mulf %66, %67 : vector<2x1xf32>
    %cst_23 = arith.constant 2.000000e+00 : f32
    %69 = vector.broadcast %cst_23 : f32 to vector<2x1xf32>
    %70 = arith.subf %69, %68 : vector<2x1xf32>
    %71 = arith.mulf %67, %70 : vector<2x1xf32>
    %72 = vector.broadcast %71 : vector<2x1xf32> to vector<2x128xf32>
    %73 = arith.mulf %64, %72 : vector<2x128xf32>
    %74 = arith.select %55, %73, %52 : vector<2x128xi1>, vector<2x128xf32>
    %c0_24 = arith.constant 0 : index
    %c0_25 = arith.constant 0 : index
    %75 = vector.load %arg3[%c0_24, %c0_25] : memref<2x128xf32, #tpu.memory_space<vmem>>, vector<2x128xf32>
    tpu.vector_store %arg3[%c0_24, %c0_25], %74 {strides = array<i32>} : memref<2x128xf32, #tpu.memory_space<vmem>>, vector<2x128xf32>,
    return
  }
}

</mosaic_0001>

<bundles_post_ra>
// kernel: tpu_custom_call.1
= control target key start
LH: loop header
LB: loop body
LE: loop exit
PB: predicated region body
PF: predicated region fallthrough
CT: control target
= control target key end

     0   :  { %8 = vsyncpa [#allocation3], 0  ;;  %s1076_s0 = inlined_call_operand.hbm [shape: f32[2,8], index: 0, kind: input, shape index: {}]   ;;  %s1077_s1 = inlined_call_operand.hbm [shape: f32[16,256], index: 1, kind: input, shape index: {}]   ;;  %s1078_s2 = inlined_call_operand.hbm [shape: f32[1024,256], index: 2, kind: input, shape index: {}]   ;;  %s1079_s3 = inlined_call_operand.hbm [shape: f32[2,128], index: 3, kind: output, shape index: {}]  }
   0x1   :  { %9 = vsyncpa [#allocation6], 0 }
   0x2   :  { %10 = vsyncpa [#allocation4], 0  ;;  %s975_s12 = smov [#allocation5]  }
   0x3   :  { %s26_s13 = sshll.u32 %s975_s12, 4  ;;  %s27_s13 = int_to_ptr.vmem [resolvable:$true] %s26_s13 }
   0x4   :  { %s897_s14 = scalar_lea.vmem %s27_s13, 512  ;;  %p902_p1 = scmp.lt.s32.totalorder %s27_s13, %s27_s13 }
   0x5   :  { %p898_p0 = scmp.ne.s32.totalorder %s27_s13, %s897_s14  ;;  %p903_p2 = scmp.lt.s32.totalorder %s897_s14, %s897_s14 }
   0x7   :  { %p904_p3 = por %p903_p2, %p902_p1 }
   0x9   :  { %p905_p4 = pnand %p904_p3, %p898_p0 }
   0xb   :  { %908 = shalt.err (!%p905_p4)
}
   0xc   :  { %s976_s15 = smov 256   ;;  %s977_s16 = smov 16  }
   0xd   :  { %32 = dma.hbm_to_vmem [thread:$0]  %s1077_s1, 512, %s27_s13, [#allocation6], %s976_s15, %s976_s15, %s977_s16  }
   0xe   :  { %s978_s19 = smov [#allocation2]   ;;  %s979_s21 = smov [#allocation7]  }
   0xf   :  { %s17_s20 = sshll.u32 %s978_s19, 4  ;;  %s38_s22 = sshll.u32 %s979_s21, 4  ;;  %s18_s20 = int_to_ptr.vmem [resolvable:$true] %s17_s20  ;;  %s39_s22 = int_to_ptr.vmem [resolvable:$true] %s38_s22 }
  0x10   :  { %s917_s23 = scalar_lea.vmem %s18_s20, 32  ;;  %p922_p6 = scmp.lt.s32.totalorder %s18_s20, %s18_s20 }
  0x11   :  { %p918_p5 = scmp.ne.s32.totalorder %s18_s20, %s917_s23  ;;  %p923_p7 = scmp.lt.s32.totalorder %s917_s23, %s917_s23 }
  0x13   :  { %p924_p8 = por %p923_p7, %p922_p6 }
  0x15   :  { %p925_p9 = pnand %p924_p8, %p918_p5 }
  0x17   :  { %928 = shalt.err (!%p925_p9)
}
  0x18   :  { %20 = dma.hbm_to_vmem [thread:$0]  %s1076_s0, 32, %s18_s20, [#allocation3]  }
  0x19   :  { %s937_s26 = scalar_lea.vmem %s39_s22, 32768  ;;  %p942_p11 = scmp.lt.s32.totalorder %s39_s22, %s39_s22 }
  0x1a   :  { %p938_p10 = scmp.ne.s32.totalorder %s39_s22, %s937_s26  ;;  %p943_p12 = scmp.lt.s32.totalorder %s937_s26, %s937_s26 }
  0x1c   :  { %p944_p13 = por %p943_p12, %p942_p11 }
  0x1e   :  { %p945_p0 = pnand %p944_p13, %p938_p10 }
  0x20   :  { %948 = shalt.err (!%p945_p0)
}
  0x21   :  { %44 = dma.hbm_to_vmem [thread:$0]  %s1078_s2, 32768, %s39_s22, [#allocation6], %s976_s15, %s976_s15, %s977_s16  }
  0x22   :  { %969 = dma.done.wait [#allocation3], 32  }
  0x23   :  { %970 = vsyncadd [#allocation3], 4294967264 }
  0x24   :  { %971 = dma.done.wait [#allocation6], 33280  }
  0x25   :  { %972 = vsyncadd [#allocation6], 4294934016  ;;  %v980_v0 = vmov 0.0   ;;  %vm981_vm0 = vmmov 0   ;;  %vm56_vm1 = vcmask 64512   ;;  %v55_v1 = vld [vmem:[#allocation5] sm:$0xff]  ;;  %v132_v56 = vlaneseq }
  0x26   :  { %858 = vmatprep.subr.mxu0 %v980_v0  ;;  %860 = vmatprep.mubr.msk.f32.mxu0 %vm981_vm0, %v980_v0  ;;  %v54_v2 = vld [vmem:[#allocation2] sm:$0x3]  ;;  %v287_v4 = vld [vmem:[#allocation7 + $0xf0] sm:$0xff]  ;;  %v286_v5 = vld [vmem:[#allocation7 + $0xe8] sm:$0xff]  ;;  %s988_s0 = smov [#allocation8]  }
  0x27   :  { %361 = vmatprep.mubr.f32.mxu1 %v980_v0  ;;  %859 = vmatpush3.msra.mxu0 %v55_v1  ;;  %v288_v3 = vld [vmem:[#allocation7 + $0xf8] sm:$0xff]  ;;  %v285_v6 = vld [vmem:[#allocation7 + $0xe0] sm:$0xff]  ;;  %v283_v8 = vld [vmem:[#allocation7 + $0xd0] sm:$0xff]  ;;  %v1019_v61 = vshrl.u32 %v132_v56, 7  ;;  %s806_s2 = sshll.u32 %s988_s0, 4  ;;  %s807_s2 = int_to_ptr.vmem [resolvable:$true] %s806_s2 }
  0x28   :  { %861 = vmatmul.mubr.msk.f32.vlgmr.msra.gmra.mxu0 %vm56_vm1, %v54_v2  ;;  %297 = vmatprep.subr.mxu1 %v288_v3  ;;  %v284_v7 = vld [vmem:[#allocation7 + $0xd8] sm:$0xff]  ;;  %v282_v9 = vld [vmem:[#allocation7 + $0xc8] sm:$0xff]  ;;  %v281_v10 = vld [vmem:[#allocation7 + $0xc0] sm:$0xff]  ;;  %s949_s28 = scalar_lea.vmem %s807_s2, 32  ;;  %p954_p2 = scmp.lt.s32.totalorder %s807_s2, %s807_s2 }
  0x29   :  { %298 = vmatpush1.msra.mxu1 %v287_v4  ;;  %v280_v11 = vld [vmem:[#allocation7 + $0xb8] sm:$0xff]  ;;  %v279_v12 = vld [vmem:[#allocation7 + $0xb0] sm:$0xff]  ;;  %v278_v13 = vld [vmem:[#allocation7 + $0xa8] sm:$0xff]  ;;  %v139_v2 = vsub.s32 2, %v1019_v61  ;;  %p950_p1 = scmp.ne.s32.totalorder %s807_s2, %s949_s28  ;;  %p955_p3 = scmp.lt.s32.totalorder %s949_s28, %s949_s28 }
  0x2a   :  { %299 = vmatprep.subr.mxu1 %v286_v5  ;;  %v277_v14 = vld [vmem:[#allocation7 + $0xa0] sm:$0xff]  ;;  %v276_v15 = vld [vmem:[#allocation7 + $0x98] sm:$0xff]  ;;  %v275_v16 = vld [vmem:[#allocation7 + $0x90] sm:$0xff] }
  0x2b   :  { %300 = vmatpush1.msra.mxu1 %v285_v6  ;;  %v274_v17 = vld [vmem:[#allocation7 + $0x88] sm:$0xff]  ;;  %v273_v18 = vld [vmem:[#allocation7 + $0x80] sm:$0xff]  ;;  %v272_v19 = vld [vmem:[#allocation7 + $0x78] sm:$0xff]  ;;  %v144_v6 = vsub.s32 3, %v1019_v61  ;;  %p956_p4 = por %p955_p3, %p954_p2 }
  0x2c   :  { %301 = vmatprep.subr.mxu1 %v284_v7  ;;  %v271_v20 = vld [vmem:[#allocation7 + $0x70] sm:$0xff]  ;;  %v270_v21 = vld [vmem:[#allocation7 + $0x68] sm:$0xff]  ;;  %v269_v22 = vld [vmem:[#allocation7 + $0x60] sm:$0xff] }
  0x2d   :  { %302 = vmatpush1.msra.mxu1 %v283_v8  ;;  %v268_v23 = vld [vmem:[#allocation7 + $0x58] sm:$0xff]  ;;  %v267_v24 = vld [vmem:[#allocation7 + $0x50] sm:$0xff]  ;;  %v266_v25 = vld [vmem:[#allocation7 + $0x48] sm:$0xff]  ;;  %p957_p5 = pnand %p956_p4, %p950_p1 }
  0x2e   :  { %303 = vmatprep.subr.mxu1 %v282_v9  ;;  %v265_v26 = vld [vmem:[#allocation7 + $0x40] sm:$0xff]  ;;  %v264_v27 = vld [vmem:[#allocation7 + $0x38] sm:$0xff]  ;;  %v263_v28 = vld [vmem:[#allocation7 + $0x30] sm:$0xff] }
  0x2f   :  { %304 = vmatpush1.msra.mxu1 %v281_v10  ;;  %v262_v29 = vld [vmem:[#allocation7 + $0x28] sm:$0xff]  ;;  %v261_v30 = vld [vmem:[#allocation7 + $0x20] sm:$0xff]  ;;  %v260_v31 = vld [vmem:[#allocation7 + $0x18] sm:$0xff] }
  0x30   :  { %305 = vmatprep.subr.mxu1 %v280_v11  ;;  %v259_v32 = vld [vmem:[#allocation7 + $0x10] sm:$0xff]  ;;  %v258_v33 = vld [vmem:[#allocation7 + $0x8] sm:$0xff]  ;;  %v257_v34 = vld [vmem:[#allocation7] sm:$0xff] }
  0x31   :  { %306 = vmatpush1.msra.mxu1 %v279_v12  ;;  %v405_v35 = vld [vmem:[#allocation7 + $0x2f8] sm:$0xff]  ;;  %v404_v36 = vld [vmem:[#allocation7 + $0x2f0] sm:$0xff]  ;;  %v403_v37 = vld [vmem:[#allocation7 + $0x2e8] sm:$0xff] }
  0x32   :  { %307 = vmatprep.subr.mxu1 %v278_v13  ;;  %542 = vmatprep.subr.mxu0 %v405_v35  ;;  %v402_v38 = vld [vmem:[#allocation7 + $0x2e0] sm:$0xff]  ;;  %v401_v39 = vld [vmem:[#allocation7 + $0x2d8] sm:$0xff]  ;;  %v400_v40 = vld [vmem:[#allocation7 + $0x2d0] sm:$0xff] }
  0x33   :  { %308 = vmatpush1.msra.mxu1 %v277_v14  ;;  %543 = vmatpush1.msra.mxu0 %v404_v36  ;;  %v399_v41 = vld [vmem:[#allocation7 + $0x2c8] sm:$0xff]  ;;  %v398_v42 = vld [vmem:[#allocation7 + $0x2c0] sm:$0xff]  ;;  %v397_v43 = vld [vmem:[#allocation7 + $0x2b8] sm:$0xff] }
  0x34   :  { %309 = vmatprep.subr.mxu1 %v276_v15  ;;  %544 = vmatprep.subr.mxu0 %v403_v37  ;;  %v396_v44 = vld [vmem:[#allocation7 + $0x2b0] sm:$0xff]  ;;  %v395_v45 = vld [vmem:[#allocation7 + $0x2a8] sm:$0xff]  ;;  %v394_v46 = vld [vmem:[#allocation7 + $0x2a0] sm:$0xff] }
  0x35   :  { %310 = vmatpush1.msra.mxu1 %v275_v16  ;;  %545 = vmatpush1.msra.mxu0 %v402_v38  ;;  %v393_v47 = vld [vmem:[#allocation7 + $0x298] sm:$0xff]  ;;  %v392_v48 = vld [vmem:[#allocation7 + $0x290] sm:$0xff]  ;;  %v391_v49 = vld [vmem:[#allocation7 + $0x288] sm:$0xff] }
  0x36   :  { %311 = vmatprep.subr.mxu1 %v274_v17  ;;  %546 = vmatprep.subr.mxu0 %v401_v39  ;;  %v390_v50 = vld [vmem:[#allocation7 + $0x280] sm:$0xff]  ;;  %v389_v51 = vld [vmem:[#allocation7 + $0x278] sm:$0xff]  ;;  %v388_v52 = vld [vmem:[#allocation7 + $0x270] sm:$0xff] }
  0x37   :  { %312 = vmatpush1.msra.mxu1 %v273_v18  ;;  %547 = vmatpush1.msra.mxu0 %v400_v40  ;;  %v387_v53 = vld [vmem:[#allocation7 + $0x268] sm:$0xff]  ;;  %v386_v54 = vld [vmem:[#allocation7 + $0x260] sm:$0xff]  ;;  %v385_v55 = vld [vmem:[#allocation7 + $0x258] sm:$0xff] }
  0x38   :  { %313 = vmatprep.subr.mxu1 %v272_v19  ;;  %548 = vmatprep.subr.mxu0 %v399_v41  ;;  %v384_v57 = vld [vmem:[#allocation7 + $0x250] sm:$0xff]  ;;  %v383_v58 = vld [vmem:[#allocation7 + $0x248] sm:$0xff]  ;;  %v382_v59 = vld [vmem:[#allocation7 + $0x240] sm:$0xff] }
  0x39   :  { %314 = vmatpush1.msra.mxu1 %v271_v20  ;;  %549 = vmatpush1.msra.mxu0 %v398_v42  ;;  %v381_v60 = vld [vmem:[#allocation7 + $0x238] sm:$0xff]  ;;  %v380_v62 = vld [vmem:[#allocation7 + $0x230] sm:$0xff]  ;;  %v379_v63 = vld [vmem:[#allocation7 + $0x228] sm:$0xff] }
  0x3a   :  { %315 = vmatprep.subr.mxu1 %v270_v21  ;;  %550 = vmatprep.subr.mxu0 %v397_v43  ;;  %v378_v0 = vld [vmem:[#allocation7 + $0x220] sm:$0xff]  ;;  %v377_v1 = vld [vmem:[#allocation7 + $0x218] sm:$0xff]  ;;  %v376_v3 = vld [vmem:[#allocation7 + $0x210] sm:$0xff] }
  0x3b   :  { %316 = vmatpush1.msra.mxu1 %v269_v22  ;;  %551 = vmatpush1.msra.mxu0 %v396_v44  ;;  %v1022_v4 = vld [vmem:[#allocation5 + $0x10] sm:$0xff]  ;;  %v375_v5 = vld [vmem:[#allocation7 + $0x208] sm:$0xff]  ;;  %v374_v7 = vld [vmem:[#allocation7 + $0x200] sm:$0xff] }
  0x3c   :  { %317 = vmatprep.subr.mxu1 %v268_v23  ;;  %552 = vmatprep.subr.mxu0 %v395_v45  ;;  %v437_v8 = vld [vmem:[#allocation7 + $0x3f8] sm:$0xff]  ;;  %v140_v9 = vrot.slane %v1022_v4, %v139_v2  ;;  %v436_v10 = vld [vmem:[#allocation7 + $0x3f0] sm:$0xff]  ;;  %v435_v11 = vld [vmem:[#allocation7 + $0x3e8] sm:$0xff]  ;;  %v145_v12 = vrot.slane %v1022_v4, %v144_v6 }
  0x3d   :  { %318 = vmatpush1.msra.mxu1 %v267_v24  ;;  %553 = vmatpush1.msra.mxu0 %v394_v46  ;;  %v434_v13 = vld [vmem:[#allocation7 + $0x3e0] sm:$0xff]  ;;  %v433_v15 = vld [vmem:[#allocation7 + $0x3d8] sm:$0xff]  ;;  %v432_v17 = vld [vmem:[#allocation7 + $0x3d0] sm:$0xff]  ;;  %v982_v46 = vmov 683565275  }
  0x3e   :  { %319 = vmatprep.subr.mxu1 %v266_v25  ;;  %554 = vmatprep.subr.mxu0 %v393_v47  ;;  %v431_v19 = vld [vmem:[#allocation7 + $0x3c8] sm:$0xff]  ;;  %v430_v21 = vld [vmem:[#allocation7 + $0x3c0] sm:$0xff]  ;;  %v429_v22 = vld [vmem:[#allocation7 + $0x3b8] sm:$0xff] }
  0x3f   :  { %320 = vmatpush1.msra.mxu1 %v265_v26  ;;  %555 = vmatpush1.msra.mxu0 %v392_v48  ;;  %v428_v24 = vld [vmem:[#allocation7 + $0x3b0] sm:$0xff]  ;;  %v427_v25 = vld [vmem:[#allocation7 + $0x3a8] sm:$0xff]  ;;  %v418_v40 = vld [vmem:[#allocation7 + $0x360] sm:$0xff]  ;;  %v983_v48 = vmov 2475754826  }
  0x40   :  { %321 = vmatprep.subr.mxu1 %v264_v27  ;;  %556 = vmatprep.subr.mxu0 %v391_v49  ;;  %v426_v27 = vld [vmem:[#allocation7 + $0x3a0] sm:$0xff]  ;;  %v420_v36 = vld [vmem:[#allocation7 + $0x370] sm:$0xff]  ;;  %v419_v38 = vld [vmem:[#allocation7 + $0x368] sm:$0xff] }
  0x41   :  { %322 = vmatpush1.msra.mxu1 %v263_v28  ;;  %557 = vmatpush1.msra.mxu0 %v390_v50  ;;  %v425_v28 = vld [vmem:[#allocation7 + $0x398] sm:$0xff]  ;;  %v416_v44 = vld [vmem:[#allocation7 + $0x350] sm:$0xff]  ;;  %v415_v50 = vld [vmem:[#allocation7 + $0x348] sm:$0xff] }
  0x42   :  { %323 = vmatprep.subr.mxu1 %v262_v29  ;;  %558 = vmatprep.subr.mxu0 %v389_v51  ;;  %v417_v41 = vld [vmem:[#allocation7 + $0x358] sm:$0xff] }
  0x43   :  { %324 = vmatpush1.msra.mxu1 %v261_v30  ;;  %559 = vmatpush1.msra.mxu0 %v388_v52  ;;  %v424_v30 = vld [vmem:[#allocation7 + $0x390] sm:$0xff]  ;;  %v984_v52 = vmov 2131351028  }
  0x44   :  { %325 = vmatprep.subr.mxu1 %v260_v31  ;;  %560 = vmatprep.subr.mxu0 %v387_v53  ;;  %v423_v31 = vld [vmem:[#allocation7 + $0x388] sm:$0xff] }
  0x45   :  { %326 = vmatpush1.msra.mxu1 %v259_v32  ;;  %561 = vmatpush1.msra.mxu0 %v386_v54 }
  0x46   :  { %327 = vmatprep.subr.mxu1 %v258_v33  ;;  %562 = vmatprep.subr.mxu0 %v385_v55  ;;  %v422_v33 = vld [vmem:[#allocation7 + $0x380] sm:$0xff]  ;;  %v985_v55 = vmov 2102212464  }
  0x47   :  { %328 = vmatpush1.msra.mxu1 %v257_v34  ;;  %563 = vmatpush1.msra.mxu0 %v384_v57  ;;  %v421_v34 = vld [vmem:[#allocation7 + $0x378] sm:$0xff] }
  0x48   :  { %564 = vmatprep.subr.mxu0 %v383_v58 }
  0x49   :  { %565 = vmatpush1.msra.mxu0 %v382_v59  ;;  %v986_v59 = vmov 920167782  }
  0x4a   :  { %566 = vmatprep.subr.mxu0 %v381_v60 }
  0x4b   :  { %567 = vmatpush1.msra.mxu0 %v380_v62 }
  0x4c   :  { %568 = vmatprep.subr.mxu0 %v379_v63  ;;  %v987_v63 = vmov 1326507024  }
  0x4d   :  { %569 = vmatpush1.msra.mxu0 %v378_v0 }
  0x4e   :  { %570 = vmatprep.subr.mxu0 %v377_v1 }
  0x4f   :  { %571 = vmatpush1.msra.mxu0 %v376_v3 }
  0x50   :  { %572 = vmatprep.subr.mxu0 %v375_v5 }
  0x51   :  { %573 = vmatpush1.msra.mxu0 %v374_v7 }
  0x52   :  { %574 = vmatprep.subr.mxu0 %v437_v8 }
  0x53   :  { %575 = vmatpush2.msra.mxu0 %v436_v10 }
  0x54   :  { %576 = vmatprep.subr.mxu0 %v435_v11 }
  0x55   :  { %577 = vmatpush2.msra.mxu0 %v434_v13 }
  0x56   :  { %578 = vmatprep.subr.mxu0 %v433_v15 }
  0x57   :  { %579 = vmatpush2.msra.mxu0 %v432_v17 }
  0x58   :  { %580 = vmatprep.subr.mxu0 %v431_v19 }
  0x59   :  { %581 = vmatpush2.msra.mxu0 %v430_v21 }
  0x5a   :  { %582 = vmatprep.subr.mxu0 %v429_v22 }
  0x5b   :  { %583 = vmatpush2.msra.mxu0 %v428_v24 }
  0x5c   :  { %584 = vmatprep.subr.mxu0 %v427_v25 }
  0x5d   :  { %585 = vmatpush2.msra.mxu0 %v426_v27 }
  0x5e   :  { %586 = vmatprep.subr.mxu0 %v425_v28 }
  0x5f   :  { %587 = vmatpush2.msra.mxu0 %v424_v30 }
  0x60   :  { %588 = vmatprep.subr.mxu0 %v423_v31 }
  0x61   :  { %589 = vmatpush2.msra.mxu0 %v422_v33 }
  0x62   :  { %590 = vmatprep.subr.mxu0 %v421_v34 }
  0x63   :  { %591 = vmatpush2.msra.mxu0 %v420_v36 }
  0x64   :  { %592 = vmatprep.subr.mxu0 %v419_v38 }
  0x65   :  { %593 = vmatpush2.msra.mxu0 %v418_v40 }
  0x66   :  { %594 = vmatprep.subr.mxu0 %v417_v41 }
  0x67   :  { %595 = vmatpush2.msra.mxu0 %v416_v44 }
  0x68   :  { %596 = vmatprep.subr.mxu0 %v415_v50 }
  0xe8   :  { %v1027_v14 = vpop.f32.mrf.mxu0 }
  0xe9   :  { %v141_v16 = vmul.f32 %v140_v9, %v1027_v14 }
  0xea   :  { %v862_v18 = vpop.f32.mrf.mxu0 }
  0xeb   :  { %v1030_v20 = vadd.f32 %v145_v12, %v141_v16 }
  0xed   :  { %v150_v23 = vand.u32 2139095040, %v1030_v20  ;;  %v147_v35 = vand.u32 2147483647, %v1030_v20  ;;  %vm149_vm9 = vcmp.lt.s32.totalorder %v1030_v20, 0  ;;  %vm239_vm14 = vweird.f32 %v1030_v20 }
  0xef   :  { %v151_v26 = vshrl.u32 %v150_v23, 23  ;;  %v154_v42 = vand.u32 8388607, %v147_v35  ;;  %vm148_vm10 = vcmp.le.f32.partialorder %v147_v35, 0.7853982 }
  0xf1   :  { %v817_v29 = vadd.s32 4294967169, %v151_v26  ;;  %v155_v1 = vor.u32 8388608, %v154_v42 }
  0xf3   :  { %v157_v32 = vadd.s32 1, %v817_v29  ;;  %v195_v17 = vshll.u32 %v155_v1, 8  ;;  %v253_v1 = vsub.s32 1, %v1019_v61 }
  0xf5   :  { %vm158_vm2 = vcmp.gt.s32.totalorder %v157_v32, 0 }
  0xf6   :  { %v159_v37 = vsel %vm158_vm2, %v157_v32, 0 }
  0xf7   :  { %v161_v39 = vand.u32 31, %v159_v37  ;;  %v160_v45 = vshrl.u32 %v159_v37, 5 }
  0xf9   :  { %v162_v43 = vsub.s32 32, %v161_v39  ;;  %v164_v47 = vshll.u32 %v982_v46, %v161_v39  ;;  %v167_v49 = vshll.u32 %v983_v48, %v161_v39  ;;  %v170_v54 = vshll.u32 %v984_v52, %v161_v39 }
  0xfa   :  { %v173_v58 = vshll.u32 %v985_v55, %v161_v39  ;;  %v176_v62 = vshll.u32 %v986_v59, %v161_v39  ;;  %vm179_vm3 = vcmp.lt.s32.totalorder %v160_v45, 1  ;;  %vm182_vm4 = vcmp.lt.s32.totalorder %v160_v45, 4 }
  0xfb   :  { %v165_v51 = vshrl.u32 %v983_v48, %v162_v43  ;;  %v168_v53 = vshrl.u32 %v984_v52, %v162_v43  ;;  %v171_v57 = vshrl.u32 %v985_v55, %v162_v43  ;;  %v174_v60 = vshrl.u32 %v986_v59, %v162_v43 }
  0xfc   :  { %v177_v0 = vshrl.u32 %v987_v63, %v162_v43  ;;  %v163_v11 = vshrl.u32 %v982_v46, %v162_v43  ;;  %vm181_vm5 = vcmp.lt.s32.totalorder %v160_v45, 3  ;;  %vm180_vm6 = vcmp.lt.s32.totalorder %v160_v45, 2 }
  0xfd   :  { %v166_v2 = vor.u32 %v165_v51, %v164_v47  ;;  %v169_v3 = vor.u32 %v168_v53, %v167_v49  ;;  %v172_v5 = vor.u32 %v171_v57, %v170_v54  ;;  %v175_v6 = vor.u32 %v174_v60, %v173_v58 }
  0xfe   :  { %v178_v7 = vor.u32 %v177_v0, %v176_v62  ;;  %v134_v0 = vsub.s32 0, %v1019_v61 }
  0xff   :  { %v184_v8 = vsel %vm182_vm4, %v172_v5, 2102212464  ;;  %v187_v9 = vsel %vm179_vm3, %v166_v2, %v169_v3  ;;  %v191_v10 = vsel %vm179_vm3, %v169_v3, %v172_v5  ;;  %v188_v12 = vsel %vm182_vm4, %v175_v6, 920167782 }
 0x100   :  { %v192_v13 = vsel %vm182_vm4, %v178_v7, 1326507024  ;;  %v189_v15 = vsel %vm181_vm5, %v172_v5, %v188_v12  ;;  %v183_v18 = vsel %vm179_vm3, %v163_v11, %v166_v2  ;;  %v185_v19 = vsel %vm181_vm5, %v169_v3, %v184_v8 }
 0x101   :  { %v193_v16 = vsel %vm181_vm5, %v175_v6, %v192_v13  ;;  %v190_v21 = vsel %vm180_vm6, %v187_v9, %v189_v15  ;;  %v186_v27 = vsel %vm180_vm6, %v183_v18, %v185_v19  ;;  %v135_v35 = vrot.slane %v1022_v4, %v134_v0  ;;  %v412_v18 = vld [vmem:[#allocation7 + $0x330] sm:$0xff]  ;;  %v411_v19 = vld [vmem:[#allocation7 + $0x328] sm:$0xff] }
 0x102   :  { %v194_v22 = vsel %vm180_vm6, %v191_v10, %v193_v16  ;;  %v1039_v25 = vmul.u32.u64.low %v195_v17, %v190_v21  ;;  %v1040_v26 = vmul.u32.u64.high %v195_v17, %v190_v21, %v1039_v25  ;;  %v202_v29 = vmul.u32 %v195_v17, %v186_v27  ;;  %v414_v16 = vld [vmem:[#allocation7 + $0x340] sm:$0xff]  ;;  %v496_v0 = vld [vmem:[#allocation7 + $0x5d0] sm:$0xff] }
 0x103   :  { %v1036_v23 = vmul.u32.u64.low %v195_v17, %v194_v22  ;;  %v1037_v24 = vmul.u32.u64.high %v195_v17, %v194_v22, %v1036_v23  ;;  %v254_v8 = vrot.slane %v1022_v4, %v253_v1  ;;  %v136_v12 = vmul.f32 %v135_v35, %v1027_v14  ;;  %597 = vmatpush2.msra.mxu0 %v414_v16  ;;  %v413_v17 = vld [vmem:[#allocation7 + $0x338] sm:$0xff]  ;;  %v410_v21 = vld [vmem:[#allocation7 + $0x320] sm:$0xff]  ;;  %v495_v1 = vld [vmem:[#allocation7 + $0x5c8] sm:$0xff] }
 0x104   :  { %v205_v28 = vadd.s32 1, %v1040_v26  ;;  %598 = vmatprep.subr.mxu0 %v413_v17  ;;  %v409_v22 = vld [vmem:[#allocation7 + $0x318] sm:$0xff]  ;;  %v408_v23 = vld [vmem:[#allocation7 + $0x310] sm:$0xff]  ;;  %v466_v27 = vld [vmem:[#allocation7 + $0x4e0] sm:$0xff]  ;;  %vm782_vm6 = vcmask 1041408  }
 0x105   :  { %vm204_vm7 = vc.u32 %v1037_v24, %v1039_v25  ;;  %v203_v42 = vadd.s32 %v1039_v25, %v1037_v24  ;;  %599 = vmatpush2.msra.mxu0 %v412_v18  ;;  %v406_v24 = vld [vmem:[#allocation7 + $0x300] sm:$0xff]  ;;  %v469_v14 = vld [vmem:[#allocation7 + $0x4f8] sm:$0xff]  ;;  %v468_v25 = vld [vmem:[#allocation7 + $0x4f0] sm:$0xff] }
 0x106   :  { %v206_v30 = vsel %vm204_vm7, %v205_v28, %v1040_v26  ;;  %600 = vmatprep.subr.mxu0 %v411_v19  ;;  %v467_v26 = vld [vmem:[#allocation7 + $0x4e8] sm:$0xff]  ;;  %627 = vmatprep.subr.mxu1 %v469_v14  ;;  %v465_v28 = vld [vmem:[#allocation7 + $0x4d8] sm:$0xff]  ;;  %v490_v35 = vld [vmem:[#allocation7 + $0x5a0] sm:$0xff]  ;;  %v291_v19 = vsub.s32 4, %v1019_v61 }
 0x107   :  { %v207_v31 = vadd.s32 %v206_v30, %v202_v29  ;;  %601 = vmatpush2.msra.mxu0 %v410_v21  ;;  %v464_v29 = vld [vmem:[#allocation7 + $0x4d0] sm:$0xff]  ;;  %v463_v30 = vld [vmem:[#allocation7 + $0x4c8] sm:$0xff]  ;;  %v481_v16 = vld [vmem:[#allocation7 + $0x558] sm:$0xff] }
 0x108   :  { %602 = vmatprep.subr.mxu0 %v409_v22  ;;  %v480_v17 = vld [vmem:[#allocation7 + $0x550] sm:$0xff]  ;;  %v479_v18 = vld [vmem:[#allocation7 + $0x548] sm:$0xff]  ;;  %v1057_v21 = vld [vmem:[#allocation5 + $0x18] sm:$0xff]  ;;  %v292_v22 = vrot.slane %v1022_v4, %v291_v19 }
 0x109   :  { %v208_v32 = vadd.s32 536870912, %v207_v31  ;;  %603 = vmatpush2.msra.mxu0 %v408_v23  ;;  %v296_v23 = vrot.slane %v1057_v21, %v291_v19  ;;  %v503_v19 = vld [vmem:[#allocation7 + $0x610] sm:$0xff] }
 0x10b   :  { %v209_v33 = vshrl.u32 %v208_v32, 30  ;;  %v461_v32 = vld [vmem:[#allocation7 + $0x4b8] sm:$0xff] }
 0x10d   :  { %v210_v34 = vshll.u32 %v209_v33, 30  ;;  %v233_v55 = vsub.s32 4, %v209_v33 }
 0x10f   :  { %v211_v36 = vsub.s32 %v207_v31, %v210_v34  ;;  %v234_v59 = vsel %vm149_vm9, %v233_v55, %v209_v33  ;;  %v462_v31 = vld [vmem:[#allocation7 + $0x4c0] sm:$0xff]  ;;  %v460_v33 = vld [vmem:[#allocation7 + $0x4b0] sm:$0xff]  ;;  %v459_v34 = vld [vmem:[#allocation7 + $0x4a8] sm:$0xff] }
 0x110   :  { %v236_v60 = vsel %vm148_vm10, 0, %v234_v59  ;;  %v439_v55 = vld [vmem:[#allocation7 + $0x408] sm:$0xff]  ;;  %v500_v59 = vld [vmem:[#allocation7 + $0x5f0] sm:$0xff] }
 0x111   :  { %v213_v37 = vsub.s32 0, %v211_v36  ;;  %v240_v62 = vadd.s32 3, %v236_v60  ;;  %v499_v60 = vld [vmem:[#allocation7 + $0x5e8] sm:$0xff] }
 0x113   :  { %v818_v38 = vmin.u32 %v213_v37, %v211_v36  ;;  %v241_v63 = vand.u32 3, %v240_v62  ;;  %v457_v37 = vld [vmem:[#allocation7 + $0x498] sm:$0xff]  ;;  %v498_v62 = vld [vmem:[#allocation7 + $0x5e0] sm:$0xff] }
 0x115   :  { %v215_v39 = vclz %v818_v38  ;;  %vm246_vm11 = vcmp.eq.s32.totalorder %v241_v63, 2  ;;  %vm243_vm12 = vcmp.eq.s32.totalorder %v241_v63, 0  ;;  %vm242_vm13 = vcmp.lt.s32.totalorder %v241_v63, 2  ;;  %v456_v38 = vld [vmem:[#allocation7 + $0x490] sm:$0xff]  ;;  %v497_v63 = vld [vmem:[#allocation7 + $0x5d8] sm:$0xff] }
 0x117   :  { %v819_v40 = vadd.s32 4294967294, %v215_v39  ;;  %v455_v39 = vld [vmem:[#allocation7 + $0x488] sm:$0xff] }
 0x119   :  { %vm820_vm8 = vcmp.lt.s32.totalorder %v819_v40, 0 }
 0x11a   :  { %v218_v41 = vsel %vm820_vm8, 0, %v819_v40  ;;  %v454_v40 = vld [vmem:[#allocation7 + $0x480] sm:$0xff] }
 0x11b   :  { %v219_v43 = vsub.s32 32, %v218_v41  ;;  %v223_v44 = vsub.s32 4294967266, %v218_v41  ;;  %v220_v45 = vshll.u32 %v211_v36, %v218_v41  ;;  %v458_v36 = vld [vmem:[#allocation7 + $0x4a0] sm:$0xff]  ;;  %v453_v41 = vld [vmem:[#allocation7 + $0x478] sm:$0xff] }
 0x11d   :  { %v221_v46 = vshrl.u32 %v203_v42, %v219_v43  ;;  %v224_v47 = vadd.s32 127, %v223_v44  ;;  %v452_v42 = vld [vmem:[#allocation7 + $0x470] sm:$0xff]  ;;  %v451_v43 = vld [vmem:[#allocation7 + $0x468] sm:$0xff]  ;;  %v450_v44 = vld [vmem:[#allocation7 + $0x460] sm:$0xff] }
 0x11f   :  { %v222_v48 = vor.u32 %v221_v46, %v220_v45  ;;  %v225_v49 = vshll.u32 %v224_v47, 23  ;;  %v449_v45 = vld [vmem:[#allocation7 + $0x458] sm:$0xff]  ;;  %v448_v46 = vld [vmem:[#allocation7 + $0x450] sm:$0xff]  ;;  %v447_v47 = vld [vmem:[#allocation7 + $0x448] sm:$0xff] }
 0x121   :  { %v226_v50 = vor.u32 4788187, %v225_v49  ;;  %v229_v52 = vcvt.s32.f32 %v222_v48  ;;  %v446_v48 = vld [vmem:[#allocation7 + $0x440] sm:$0xff]  ;;  %v445_v49 = vld [vmem:[#allocation7 + $0x438] sm:$0xff] }
 0x123   :  { %v227_v51 = vand.u32 2147483647, %v226_v50  ;;  %v444_v50 = vld [vmem:[#allocation7 + $0x430] sm:$0xff] }
 0x125   :  { %v230_v53 = vmul.f32 %v229_v52, %v227_v51  ;;  %v443_v51 = vld [vmem:[#allocation7 + $0x428] sm:$0xff]  ;;  %v442_v52 = vld [vmem:[#allocation7 + $0x420] sm:$0xff] }
 0x127   :  { %v231_v54 = vxor.u32 2147483648, %v230_v53 }
 0x129   :  { %v232_v57 = vsel %vm149_vm9, %v231_v54, %v230_v53  ;;  %v441_v53 = vld [vmem:[#allocation7 + $0x418] sm:$0xff]  ;;  %v440_v54 = vld [vmem:[#allocation7 + $0x410] sm:$0xff] }
 0x12a   :  { %v235_v58 = vsel %vm148_vm10, %v1030_v20, %v232_v57  ;;  %v407_v20 = vld [vmem:[#allocation7 + $0x308] sm:$0xff]  ;;  %v438_v57 = vld [vmem:[#allocation7 + $0x400] sm:$0xff] }
 0x12b   :  { %881 = vcosq.f32 %v235_v58  ;;  %604 = vmatprep.subr.mxu0 %v407_v20 }
 0x12c   :  { %883 = vsinq.f32 %v235_v58  ;;  %605 = vmatpush2.msra.mxu0 %v406_v24  ;;  %v501_v58 = vld [vmem:[#allocation7 + $0x5f8] sm:$0xff] }
 0x138   :  { %v882_v2 = vpop.eup %881 }
 0x139   :  { %v884_v3 = vpop.eup %883  ;;  %v247_v5 = vxor.u32 2147483648, %v882_v2 }
 0x13a   :  { %v244_v6 = vxor.u32 2147483648, %v884_v3 }
 0x13b   :  { %v248_v7 = vsel %vm246_vm11, %v247_v5, %v884_v3  ;;  %v493_v3 = vld [vmem:[#allocation7 + $0x5b8] sm:$0xff]  ;;  %v492_v5 = vld [vmem:[#allocation7 + $0x5b0] sm:$0xff] }
 0x13c   :  { %v245_v9 = vsel %vm243_vm12, %v882_v2, %v244_v6  ;;  %v494_v2 = vld [vmem:[#allocation7 + $0x5c0] sm:$0xff]  ;;  %v491_v6 = vld [vmem:[#allocation7 + $0x5a8] sm:$0xff] }
 0x13d   :  { %v249_v10 = vsel %vm242_vm13, %v245_v9, %v248_v7  ;;  %v489_v7 = vld [vmem:[#allocation7 + $0x598] sm:$0xff]  ;;  %v487_v9 = vld [vmem:[#allocation7 + $0x588] sm:$0xff] }
 0x13e   :  { %v250_v11 = vsel %vm239_vm14, nan, %v249_v10  ;;  %v486_v10 = vld [vmem:[#allocation7 + $0x580] sm:$0xff] }
 0x13f   :  { %v255_v13 = vmul.f32 %v254_v8, %v250_v11  ;;  %v488_v8 = vld [vmem:[#allocation7 + $0x590] sm:$0xff]  ;;  %v485_v11 = vld [vmem:[#allocation7 + $0x578] sm:$0xff] }
 0x141   :  { %v256_v15 = vadd.f32 %v255_v13, %v136_v12  ;;  %v484_v12 = vld [vmem:[#allocation7 + $0x570] sm:$0xff]  ;;  %v483_v13 = vld [vmem:[#allocation7 + $0x568] sm:$0xff] }
 0x143   :  { %362 = vmatmul.mubr.f32.vlgmr.msra.gmra.mxu1 %v256_v15  ;;  %v482_v15 = vld [vmem:[#allocation7 + $0x560] sm:$0xff] }
 0x144   :  { %628 = vmatpush1.msra.mxu1 %v468_v25 }
 0x145   :  { %629 = vmatprep.subr.mxu1 %v467_v26 }
 0x146   :  { %630 = vmatpush1.msra.mxu1 %v466_v27 }
 0x147   :  { %631 = vmatprep.subr.mxu1 %v465_v28 }
 0x148   :  { %632 = vmatpush1.msra.mxu1 %v464_v29 }
 0x149   :  { %633 = vmatprep.subr.mxu1 %v463_v30  ;;  %v478_v30 = vld [vmem:[#allocation7 + $0x540] sm:$0xff] }
 0x14a   :  { %634 = vmatpush1.msra.mxu1 %v462_v31  ;;  %v477_v31 = vld [vmem:[#allocation7 + $0x538] sm:$0xff] }
 0x14b   :  { %635 = vmatprep.subr.mxu1 %v461_v32  ;;  %v476_v32 = vld [vmem:[#allocation7 + $0x530] sm:$0xff] }
 0x14c   :  { %636 = vmatpush1.msra.mxu1 %v460_v33  ;;  %v475_v33 = vld [vmem:[#allocation7 + $0x528] sm:$0xff] }
 0x14d   :  { %637 = vmatprep.subr.mxu1 %v459_v34  ;;  %v474_v34 = vld [vmem:[#allocation7 + $0x520] sm:$0xff] }
 0x14e   :  { %638 = vmatpush1.msra.mxu1 %v458_v36  ;;  %v473_v36 = vld [vmem:[#allocation7 + $0x518] sm:$0xff] }
 0x14f   :  { %639 = vmatprep.subr.mxu1 %v457_v37  ;;  %v472_v37 = vld [vmem:[#allocation7 + $0x510] sm:$0xff] }
 0x150   :  { %640 = vmatpush1.msra.mxu1 %v456_v38  ;;  %v471_v38 = vld [vmem:[#allocation7 + $0x508] sm:$0xff] }
 0x151   :  { %641 = vmatprep.subr.mxu1 %v455_v39  ;;  %v470_v39 = vld [vmem:[#allocation7 + $0x500] sm:$0xff] }
 0x152   :  { %642 = vmatpush1.msra.mxu1 %v454_v40  ;;  %v533_v40 = vld [vmem:[#allocation7 + $0x7f0] sm:$0xff] }
 0x153   :  { %643 = vmatprep.subr.mxu1 %v453_v41  ;;  %v517_v41 = vld [vmem:[#allocation7 + $0x6f0] sm:$0xff]  ;;  %823 = vmatprep.subr.mxu0 %v533_v40 }
 0x154   :  { %644 = vmatpush1.msra.mxu1 %v452_v42  ;;  %v532_v42 = vld [vmem:[#allocation7 + $0x7e0] sm:$0xff] }
 0x155   :  { %645 = vmatprep.subr.mxu1 %v451_v43  ;;  %v516_v43 = vld [vmem:[#allocation7 + $0x6e0] sm:$0xff] }
 0x156   :  { %646 = vmatpush1.msra.mxu1 %v450_v44  ;;  %v531_v44 = vld [vmem:[#allocation7 + $0x7d0] sm:$0xff] }
 0x157   :  { %647 = vmatprep.subr.mxu1 %v449_v45  ;;  %v515_v45 = vld [vmem:[#allocation7 + $0x6d0] sm:$0xff] }
 0x158   :  { %648 = vmatpush1.msra.mxu1 %v448_v46  ;;  %v530_v46 = vld [vmem:[#allocation7 + $0x7c0] sm:$0xff] }
 0x159   :  { %649 = vmatprep.subr.mxu1 %v447_v47  ;;  %v514_v47 = vld [vmem:[#allocation7 + $0x6c0] sm:$0xff] }
 0x15a   :  { %650 = vmatpush1.msra.mxu1 %v446_v48  ;;  %v529_v48 = vld [vmem:[#allocation7 + $0x7b0] sm:$0xff] }
 0x15b   :  { %651 = vmatprep.subr.mxu1 %v445_v49  ;;  %v513_v49 = vld [vmem:[#allocation7 + $0x6b0] sm:$0xff] }
 0x15c   :  { %652 = vmatpush1.msra.mxu1 %v444_v50  ;;  %v528_v50 = vld [vmem:[#allocation7 + $0x7a0] sm:$0xff] }
 0x15d   :  { %653 = vmatprep.subr.mxu1 %v443_v51  ;;  %v512_v51 = vld [vmem:[#allocation7 + $0x6a0] sm:$0xff] }
 0x15e   :  { %654 = vmatpush1.msra.mxu1 %v442_v52  ;;  %v527_v52 = vld [vmem:[#allocation7 + $0x790] sm:$0xff] }
 0x15f   :  { %655 = vmatprep.subr.mxu1 %v441_v53  ;;  %v511_v53 = vld [vmem:[#allocation7 + $0x690] sm:$0xff] }
 0x160   :  { %656 = vmatpush1.msra.mxu1 %v440_v54  ;;  %v526_v54 = vld [vmem:[#allocation7 + $0x780] sm:$0xff] }
 0x161   :  { %657 = vmatprep.subr.mxu1 %v439_v55  ;;  %v510_v55 = vld [vmem:[#allocation7 + $0x680] sm:$0xff] }
 0x162   :  { %658 = vmatpush1.msra.mxu1 %v438_v57  ;;  %v525_v57 = vld [vmem:[#allocation7 + $0x770] sm:$0xff] }
 0x163   :  { %659 = vmatprep.subr.mxu1 %v501_v58  ;;  %v509_v58 = vld [vmem:[#allocation7 + $0x670] sm:$0xff] }
 0x164   :  { %660 = vmatpush2.msra.mxu1 %v500_v59  ;;  %v524_v59 = vld [vmem:[#allocation7 + $0x760] sm:$0xff] }
 0x165   :  { %661 = vmatprep.subr.mxu1 %v499_v60  ;;  %v508_v60 = vld [vmem:[#allocation7 + $0x660] sm:$0xff] }
 0x166   :  { %662 = vmatpush2.msra.mxu1 %v498_v62  ;;  %v523_v62 = vld [vmem:[#allocation7 + $0x750] sm:$0xff] }
 0x167   :  { %663 = vmatprep.subr.mxu1 %v497_v63  ;;  %v507_v63 = vld [vmem:[#allocation7 + $0x650] sm:$0xff] }
 0x168   :  { %664 = vmatpush2.msra.mxu1 %v496_v0  ;;  %v522_v0 = vld [vmem:[#allocation7 + $0x740] sm:$0xff] }
 0x169   :  { %665 = vmatprep.subr.mxu1 %v495_v1  ;;  %v536_v1 = vsub.s32 5, %v1019_v61 }
 0x16a   :  { %666 = vmatpush2.msra.mxu1 %v494_v2 }
 0x16b   :  { %667 = vmatprep.subr.mxu1 %v493_v3  ;;  %v537_v2 = vrot.slane %v1022_v4, %v536_v1  ;;  %v541_v3 = vrot.slane %v1057_v21, %v536_v1 }
 0x16c   :  { %668 = vmatpush2.msra.mxu1 %v492_v5 }
 0x16d   :  { %669 = vmatprep.subr.mxu1 %v491_v6 }
 0x16e   :  { %670 = vmatpush2.msra.mxu1 %v490_v35 }
 0x16f   :  { %671 = vmatprep.subr.mxu1 %v489_v7 }
 0x170   :  { %672 = vmatpush2.msra.mxu1 %v488_v8 }
 0x171   :  { %673 = vmatprep.subr.mxu1 %v487_v9 }
 0x172   :  { %674 = vmatpush2.msra.mxu1 %v486_v10 }
 0x173   :  { %675 = vmatprep.subr.mxu1 %v485_v11 }
 0x174   :  { %676 = vmatpush2.msra.mxu1 %v484_v12  ;;  %v506_v12 = vld [vmem:[#allocation7 + $0x640] sm:$0xff] }
 0x175   :  { %677 = vmatprep.subr.mxu1 %v483_v13  ;;  %v521_v13 = vld [vmem:[#allocation7 + $0x730] sm:$0xff] }
 0x176   :  { %678 = vmatpush2.msra.mxu1 %v482_v15  ;;  %v505_v15 = vld [vmem:[#allocation7 + $0x630] sm:$0xff] }
 0x177   :  { %679 = vmatprep.subr.mxu1 %v481_v16  ;;  %v520_v16 = vld [vmem:[#allocation7 + $0x720] sm:$0xff] }
 0x178   :  { %680 = vmatpush2.msra.mxu1 %v480_v17  ;;  %v504_v17 = vld [vmem:[#allocation7 + $0x620] sm:$0xff] }
 0x179   :  { %681 = vmatprep.subr.mxu1 %v479_v18  ;;  %v519_v18 = vld [vmem:[#allocation7 + $0x710] sm:$0xff] }
 0x17a   :  { %682 = vmatpush2.msra.mxu1 %v478_v30 }
 0x17b   :  { %683 = vmatprep.subr.mxu1 %v477_v31 }
 0x17c   :  { %684 = vmatpush2.msra.mxu1 %v476_v32 }
 0x17d   :  { %685 = vmatprep.subr.mxu1 %v475_v33  ;;  %v706_v33 = vsub.s32 7, %v1019_v61 }
 0x17e   :  { %686 = vmatpush2.msra.mxu1 %v474_v34 }
 0x17f   :  { %687 = vmatprep.subr.mxu1 %v473_v36  ;;  %v779_v36 = vand.u32 127, %v132_v56 }
 0x180   :  { %688 = vmatpush2.msra.mxu1 %v472_v37  ;;  %v707_v37 = vrot.slane %v1022_v4, %v706_v33 }
 0x181   :  { %689 = vmatprep.subr.mxu1 %v471_v38  ;;  %vm780_vm5 = vcmp.lt.s32.totalorder %v779_v36, 4 }
 0x182   :  { %690 = vmatpush2.msra.mxu1 %v470_v39 }
 0x203   :  { %v363_v20 = vpop.f32.mrf.mxu1 }
 0x204   :  { %v364_v24 = vadd.f32 %v363_v20, %v292_v22  ;;  %v518_v22 = vld [vmem:[#allocation7 + $0x700] sm:$0xff]  ;;  %v621_v20 = vsub.s32 6, %v1019_v61 }
 0x205   :  { %v365_v14 = vpop.f32.mrf.mxu1 }
 0x206   :  { %v366_v25 = vadd.f32 %v365_v14, %v296_v23  ;;  %v370_v26 = vmul.f32 0.2, %v364_v24  ;;  %vm368_vm15 = vcmp.ge.f32.partialorder %v364_v24, 0.0  ;;  %v502_v23 = vld [vmem:[#allocation7 + $0x600] sm:$0xff]  ;;  %v626_v14 = vrot.slane %v1057_v21, %v621_v20 }
 0x208   :  { %v371_v27 = vmul.f32 0.2, %v366_v25  ;;  %vm369_vm0 = vcmp.ge.f32.partialorder %v366_v25, 0.0  ;;  %v372_v29 = vsel %vm368_vm15, %v364_v24, %v370_v26  ;;  %v622_v24 = vrot.slane %v1022_v4, %v621_v20 }
 0x20a   :  { %v373_v28 = vsel %vm369_vm0, %v366_v25, %v371_v27 }
 0x20b   :  { %606 = vmatprep.mubr.f32.mxu0 %v373_v28 }
 0x20c   :  { %607 = vmatmul.mubr.f32.vlgmr.msra.gmra.mxu0 %v372_v29 }
 0x20d   :  { %824 = vmatpush3.msra.mxu0 %v517_v41 }
 0x20e   :  { %825 = vmatprep.subr.mxu0 %v532_v42 }
 0x20f   :  { %826 = vmatpush3.msra.mxu0 %v516_v43 }
 0x210   :  { %827 = vmatprep.subr.mxu0 %v531_v44 }
 0x211   :  { %828 = vmatpush3.msra.mxu0 %v515_v45 }
 0x212   :  { %829 = vmatprep.subr.mxu0 %v530_v46 }
 0x213   :  { %830 = vmatpush3.msra.mxu0 %v514_v47 }
 0x214   :  { %831 = vmatprep.subr.mxu0 %v529_v48 }
 0x215   :  { %832 = vmatpush3.msra.mxu0 %v513_v49 }
 0x216   :  { %833 = vmatprep.subr.mxu0 %v528_v50 }
 0x217   :  { %834 = vmatpush3.msra.mxu0 %v512_v51 }
 0x218   :  { %835 = vmatprep.subr.mxu0 %v527_v52 }
 0x219   :  { %836 = vmatpush3.msra.mxu0 %v511_v53 }
 0x21a   :  { %837 = vmatprep.subr.mxu0 %v526_v54 }
 0x21b   :  { %838 = vmatpush3.msra.mxu0 %v510_v55 }
 0x21c   :  { %839 = vmatprep.subr.mxu0 %v525_v57 }
 0x21d   :  { %840 = vmatpush3.msra.mxu0 %v509_v58 }
 0x21e   :  { %841 = vmatprep.subr.mxu0 %v524_v59 }
 0x21f   :  { %842 = vmatpush3.msra.mxu0 %v508_v60 }
 0x220   :  { %843 = vmatprep.subr.mxu0 %v523_v62 }
 0x221   :  { %844 = vmatpush3.msra.mxu0 %v507_v63 }
 0x222   :  { %845 = vmatprep.subr.mxu0 %v522_v0 }
 0x223   :  { %846 = vmatpush3.msra.mxu0 %v506_v12 }
 0x224   :  { %847 = vmatprep.subr.mxu0 %v521_v13 }
 0x225   :  { %848 = vmatpush3.msra.mxu0 %v505_v15 }
 0x226   :  { %849 = vmatprep.subr.mxu0 %v520_v16 }
 0x227   :  { %850 = vmatpush3.msra.mxu0 %v504_v17 }
 0x228   :  { %851 = vmatprep.subr.mxu0 %v519_v18 }
 0x229   :  { %852 = vmatpush3.msra.mxu0 %v503_v19 }
 0x22a   :  { %853 = vmatprep.subr.mxu0 %v518_v22 }
 0x22b   :  { %854 = vmatpush3.msra.mxu0 %v502_v23 }
 0x2cc   :  { %v608_v5 = vpop.f32.mrf.mxu0 }
 0x2cd   :  { %v609_v6 = vadd.f32 %v608_v5, %v537_v2 }
 0x2ce   :  { %v610_v35 = vpop.f32.mrf.mxu0 }
 0x2cf   :  { %v611_v7 = vadd.f32 %v610_v35, %v541_v3  ;;  %v615_v8 = vmul.f32 0.2, %v609_v6  ;;  %vm613_vm1 = vcmp.ge.f32.partialorder %v609_v6, 0.0 }
 0x2d1   :  { %v616_v9 = vmul.f32 0.2, %v611_v7  ;;  %vm614_vm2 = vcmp.ge.f32.partialorder %v611_v7, 0.0  ;;  %v617_v11 = vsel %vm613_vm1, %v609_v6, %v615_v8 }
 0x2d3   :  { %v618_v10 = vsel %vm614_vm2, %v611_v7, %v616_v9 }
 0x2d4   :  { %691 = vmatprep.mubr.f32.mxu1 %v618_v10 }
 0x2d5   :  { %692 = vmatmul.mubr.f32.vlgmr.msra.gmra.mxu1 %v617_v11 }
 0x395   :  { %v693_v25 = vpop.f32.mrf.mxu1 }
 0x396   :  { %v694_v26 = vadd.f32 %v693_v25, %v622_v24 }
 0x397   :  { %v695_v27 = vpop.f32.mrf.mxu1 }
 0x398   :  { %v696_v28 = vadd.f32 %v695_v27, %v626_v14  ;;  %v700_v29 = vmul.f32 0.2, %v694_v26  ;;  %vm698_vm3 = vcmp.ge.f32.partialorder %v694_v26, 0.0 }
 0x39a   :  { %v701_v30 = vmul.f32 0.2, %v696_v28  ;;  %vm699_vm4 = vcmp.ge.f32.partialorder %v696_v28, 0.0  ;;  %v702_v32 = vsel %vm698_vm3, %v694_v26, %v700_v29 }
 0x39c   :  { %v703_v31 = vsel %vm699_vm4, %v696_v28, %v701_v30 }
 0x39d   :  { %772 = vmatprep.mubr.f32.mxu0 %v703_v31 }
 0x39e   :  { %773 = vmatmul.mubr.f32.vlgmr.msra.gmra.mxu0 %v702_v32 }
 0x45e   :  { %v855_v34 = vpop.f32.mrf.mxu0 }
 0x460   :  { %v856_v21 = vpop.f32.mrf.mxu0 }
 0x461   :  { %v857_v38 = vadd.f32 %v856_v21, %v855_v34 }
 0x463   :  { %v775_v39 = vadd.f32 %v857_v38, %v707_v37 }
 0x465   :  { %v781_v40 = vsel %vm780_vm5, %v775_v39, -inf }
 0x466   :  { %v783_v41 = vsel %vm782_vm6, %v781_v40, -inf }
 0x467   :  { %784 = vmax.xlane.f32.xlu0 %v783_v41 }
 0x4f0   :  { %v785_v42 = vpop.xlane.xlu0 %784 }
 0x4f1   :  { %v786_v43 = vsub.f32 %v781_v40, %v785_v42 }
 0x4f3   :  { %v787_v44 = vmul.f32 1.442695, %v786_v43 }
 0x4f5   :  { %885 = vpow2.f32 %v787_v44 }
 0x502   :  { %v886_v45 = vpop.eup %885 }
 0x503   :  { %v789_v61 = vsel %vm780_vm5, %v886_v45, 0.0 }
 0x504   :  { %v790_v46 = vsel %vm782_vm6, %v789_v61, 0.0 }
 0x505   :  { %791 = vadd.xlane.f32.xlu0 %v790_v46 }
 0x58e   :  { %v792_v56 = vpop.xlane.xlu0 %791 }
 0x58f   :  { %887 = vrcp.f32 %v792_v56 }
 0x59c   :  { %v888_v4 = vpop.eup %887 }
 0x59d   :  { %v794_v47 = vmul.f32 %v888_v4, %v792_v56 }
 0x59f   :  { %v795_v48 = vsub.f32 2.0, %v794_v47 }
 0x5a1   :  { %v796_v49 = vmul.f32 %v888_v4, %v795_v48 }
 0x5a3   :  { %v797_v50 = vmul.f32 %v796_v49, %v789_v61 }
 0x5a5   :  { %v798_v51 = vsel %vm780_vm5, %v797_v50, %v775_v39 }
 0x5a6   :  { %799 = vst [vmem:[#allocation8] sm:$0x3] %v798_v51 }
 0x5a7   :  { %960 = shalt.err (!%p957_p5)
}
 0x5a8   :  { %809 = dma.vmem_to_hbm [thread:$0]  %s807_s2, 32, %s1079_s3, [#allocation4]  }
 0x5a9   :  { %973 = dma.done.wait [#allocation4], 32  }
 0x5aa   :  { %974 = vsyncadd [#allocation4], 4294967264 }
 0x5ab   :  { %813 = vsyncpa [#allocation3], 1 }
 0x5ac   :  { %814 = vsyncpa [#allocation6], 1 }
 0x5ad   :  { %815 = vsyncpa [#allocation4], 1 }

</bundles_post_ra>
